<compile_context>
chip_gen: v5e
topology: v5e:2x2
jax: 0.10.0
libtpu: 0.0.40
codegen_flags: <defaults>
</compile_context>

<pallas_src>
import jax
import jax.numpy as jnp
from jax.experimental import pallas as pl
from jax.experimental.pallas import tpu as pltpu

_MIB = 1024 * 1024


# ---------------------------------------------------------------------------
# small helpers
# ---------------------------------------------------------------------------
def _round_up(x, m):
    return (x + m - 1) // m * m


def _pick_tile(dim, pref, align):
    """Largest `align`-aligned tile around `pref` that minimizes padding of `dim`."""
    if dim <= pref:
        return max(align, _round_up(dim, align))
    splits = pl.cdiv(dim, pref)
    return _round_up(pl.cdiv(dim, splits), align)


def _pad2(a, rows, cols):
    pr, pc = rows - a.shape[0], cols - a.shape[1]
    if pr or pc:
        a = jnp.pad(a, ((0, pr), (0, pc)))
    return a


def _tpu_info():
    try:
        return pltpu.get_tpu_info()
    except Exception:
        return None


def _vmem_capacity_bytes():
    info = _tpu_info()
    cap = getattr(info, "vmem_capacity_bytes", None) if info is not None else None
    if cap:
        return int(cap)
    return 64 * _MIB  # conservative fallback: v7x per-TC VMEM


def _num_tensorcores():
    info = _tpu_info()
    if info is not None:
        for name in ("num_cores", "num_tensorcores", "tensorcore_count", "core_count"):
            v = getattr(info, name, None)
            if isinstance(v, int) and v > 0:
                return v
    return 1


# ---------------------------------------------------------------------------
# Pallas kernels: K-tiled 2-layer MLP (channel-parallel all-reduce == K reduction)
#   grid = (row tiles i [parallel], out-column tiles j [parallel], hidden tiles k [arbitrary])
#   k==0      : out = relu(x @ W1_k + b1_k) @ W2_k + b2        (b2 folded into first step)
#   k>0       : out += relu(x @ W1_k + b1_k) @ W2_k
# ---------------------------------------------------------------------------
def _partial_mlp(x_ref, w1_ref, b1_ref, w2_ref):
    # x / W1 / W2 arrive pre-cast (bf16 by default) -> MXU matmuls, f32 accumulation.
    # bias + ReLU stay f32 (v5e VPU has no bf16).
    h = jnp.dot(x_ref[...], w1_ref[...], preferred_element_type=jnp.float32)
    h = jnp.maximum(h + b1_ref[...], 0.0)
    return jnp.dot(h.astype(w2_ref.dtype), w2_ref[...],
                   preferred_element_type=jnp.float32)


def _mlp_kernel_f32out(x_ref, w1_ref, b1_ref, w2_ref, b2_ref, o_ref):
    """f32 output: accumulate directly into the resident output block (no scratch)."""
    k = pl.program_id(2)
    part = _partial_mlp(x_ref, w1_ref, b1_ref, w2_ref)

    @pl.when(k == 0)
    def _():
        o_ref[...] = part + b2_ref[...]          # fold b2; no zero-init pass

    @pl.when(k != 0)
    def _():
        o_ref[...] += part


def _mlp_kernel_castout(x_ref, w1_ref, b1_ref, w2_ref, b2_ref, o_ref, acc_ref):
    """non-f32 output: row-tile f32 accumulator, cast once on the last K step."""
    k = pl.program_id(2)
    part = _partial_mlp(x_ref, w1_ref, b1_ref, w2_ref)

    @pl.when(k == 0)
    def _():
        acc_ref[...] = part + b2_ref[...]

    @pl.when(k != 0)
    def _():
        acc_ref[...] += part

    @pl.when(k == pl.num_programs(2) - 1)
    def _():
        o_ref[...] = acc_ref[...].astype(o_ref.dtype)


# ---------------------------------------------------------------------------
# ChannelParallel MLP wrapper (weights prepped once, activations per call)
# ---------------------------------------------------------------------------
class ChannelParallelMLP:
    """Equivalent of the ChannelParallel (column-parallel + row-parallel + all-reduce) MLP;
    the shard sum is realized as the trailing K-reduction grid axis on one TensorCore."""

    def __init__(self, w1, b1, w2, b2, *, compute_dtype=jnp.bfloat16,
                 tile_n=256, tile_k=None, tile_dout=None):
        d_in, hidden = w1.shape
        hidden_w, d_out = w2.shape
        assert hidden == hidden_w
        b1 = jnp.reshape(jnp.asarray(b1, jnp.float32), (1, hidden))
        b2 = jnp.reshape(jnp.asarray(b2, jnp.float32), (1, d_out))

        self._d_in, self._hidden, self._d_out = d_in, hidden, d_out
        self._compute_dtype = compute_dtype

        # Generation-aware budgets: real VMEM capacity minus headroom for compiler scratch.
        self._vmem_cap = _vmem_capacity_bytes()
        self._num_cores = _num_tensorcores()
        self._usable_vmem = max(self._vmem_cap - 8 * _MIB, self._vmem_cap // 2)

        self._tile_n_pref = max(8, _round_up(min(tile_n, 512), 8))
        self._tile_dout_override = tile_dout

        d_in_p = _round_up(d_in, 128)
        d_out_p = _round_up(d_out, 128)

        if tile_k is None:
            # bigger VMEM (v5e/v6e 128 MiB) -> bigger K tile -> fewer K steps / RMW passes
            tile_k_pref = 1024 if self._vmem_cap >= 100 * _MIB else 512
            tile_k = _pick_tile(hidden, tile_k_pref, 128)
        else:
            tile_k = max(128, _round_up(min(tile_k, _round_up(hidden, 128)), 128))

        # Shrink the K tile until the (conservative) working set fits the VMEM budget.
        w_item = jnp.dtype(compute_dtype).itemsize
        while tile_k > 128:
            est = self._vmem_estimate(self._tile_n_pref, tile_k, d_in_p, d_out_p,
                                      w_item, 4, True)
            if est + 8 * _MIB <= self._usable_vmem:
                break
            tile_k = max(128, _round_up(tile_k // 2, 128))
        hidden_p = _round_up(hidden, tile_k)

        self._tile_k = tile_k
        self._d_in_p, self._hidden_p, self._d_out_p = d_in_p, hidden_p, d_out_p

        # One-time weight prep (hoisted out of the forward path): pad to tile-aligned
        # lane-dense shapes and cast to the MXU compute dtype.
        # TODO(synk): optional int8 weight path (per-column scales) for v5e/v6e int MXUs.
        self._w1 = _pad2(jnp.asarray(w1), d_in_p, hidden_p).astype(compute_dtype)
        self._b1 = _pad2(b1, 1, hidden_p)
        self._w2 = _pad2(jnp.asarray(w2), hidden_p, d_out_p).astype(compute_dtype)
        self._b2 = _pad2(b2, 1, d_out_p)

    @staticmethod
    def _vmem_estimate(tile_n, tile_k, d_in_p, tile_dout, w_item, x_item, needs_scratch):
        est = 2 * (tile_n * d_in_p * x_item            # x tile (double-buffered)
                   + d_in_p * tile_k * w_item          # W1 K tile
                   + tile_k * 4                        # b1 tile (f32)
                   + tile_k * tile_dout * w_item       # W2 K tile
                   + tile_dout * 4)                    # b2 tile (f32)
        est += 2 * tile_n * tile_dout * 4              # output block (worst case f32)
        if needs_scratch:
            est += tile_n * tile_dout * 4              # f32 accumulator scratch
        est += 2 * tile_n * tile_k * 4                 # hidden intermediate + slack
        return est

    def __call__(self, x):
        assert x.ndim == 2 and x.shape[1] == self._d_in
        n = x.shape[0]
        out_dtype = x.dtype

        # Row tile: minimize row padding, 8-aligned (sublane).
        tile_n = _pick_tile(n, self._tile_n_pref, 8)
        n_p = _round_up(n, tile_n)
        n_row_tiles = n_p // tile_n

        # Output-column tile: split only when a 2-TC chip would otherwise idle one core.
        d_out_p = self._d_out_p
        if self._tile_dout_override is not None:
            tile_dout = self._tile_dout_override
            assert tile_dout % 128 == 0 and d_out_p % tile_dout == 0
        elif self._num_cores >= 2 and n_row_tiles == 1 and d_out_p % 256 == 0:
            tile_dout = d_out_p // 2
        else:
            tile_dout = d_out_p
        n_col_tiles = d_out_p // tile_dout

        # Activations: cast to the MXU dtype and pad once here (XLA), not per K step.
        x_p = _pad2(x.astype(self._compute_dtype), n_p, self._d_in_p)

        tile_k = self._tile_k
        grid = (n_row_tiles, n_col_tiles, self._hidden_p // tile_k)

        f32_out = (out_dtype == jnp.float32)
        kernel = _mlp_kernel_f32out if f32_out else _mlp_kernel_castout
        scratch = [] if f32_out else [pltpu.VMEM((tile_n, tile_dout), jnp.float32)]

        w_item = jnp.dtype(self._compute_dtype).itemsize
        est = self._vmem_estimate(tile_n, tile_k, self._d_in_p, tile_dout,
                                  w_item, jnp.dtype(x_p.dtype).itemsize, not f32_out)
        vmem_limit = int(min(max(est + 8 * _MIB, min(32 * _MIB, self._usable_vmem)),
                             self._usable_vmem))

        d_in_p = self._d_in_p
        grid_spec = pltpu.PrefetchScalarGridSpec(
            num_scalar_prefetch=0,
            grid=grid,
            in_specs=[
                pl.BlockSpec((tile_n, d_in_p),   lambda i, j, k: (i, 0)),  # x row tile
                pl.BlockSpec((d_in_p, tile_k),   lambda i, j, k: (0, k)),  # W1 K tile
                pl.BlockSpec((1, tile_k),        lambda i, j, k: (0, k)),  # b1 K tile
                pl.BlockSpec((tile_k, tile_dout), lambda i, j, k: (k, j)),  # W2 tile
                pl.BlockSpec((1, tile_dout),     lambda i, j, k: (0, j)),  # b2 tile
            ],
            out_specs=pl.BlockSpec((tile_n, tile_dout), lambda i, j, k: (i, j)),
            scratch_shapes=scratch,
        )

        out = pl.pallas_call(
            kernel,
            out_shape=jax.ShapeDtypeStruct((n_p, d_out_p), out_dtype),
            grid_spec=grid_spec,
            compiler_params=pltpu.CompilerParams(
                dimension_semantics=("parallel", "parallel", "arbitrary"),
                vmem_limit_bytes=vmem_limit,
            ),
        )(x_p, self._w1, self._b1, self._w2, self._b2)

        return out[:n, :self._d_out]


# ---------------------------------------------------------------------------
# ParallelModule equivalent
# ---------------------------------------------------------------------------
class ParallelModuleJAX:
    """JAX/Pallas counterpart of ParallelModule: forward() delegates to the
    (tensor-parallel) wrapped model; dp_scatter / dp_gather are plain-JAX glue."""

    def __init__(self, params, tp_size=2, dp_world_size=1, **mlp_kwargs):
        self._tp_size = tp_size          # metadata only: TP all-reduce == K-tiled reduction
        self._dp_world_size = dp_world_size
        self._dp_gap_size = 0
        self._gs_model = False
        # "_parallize": the ChannelParallel inter_model as a single fused Pallas kernel.
        # Weight padding / bf16 cast are hoisted here (one time), not per forward call.
        self.model = ChannelParallelMLP(params["w1"], params["b1"],
                                        params["w2"], params["b2"], **mlp_kwargs)

    def reset_dp_gap_size(self):
        self._dp_gap_size = 0

    # dp_scatter: pad leading dim to a multiple of dp_world_size, take local part.
    # NOTE: mutates Python-side self._dp_gap_size (not jit-safe), mirroring the original.
    def dp_scatter(self, x, local_part=0):
        n = x.shape[0]
        part_size = n // self._dp_world_size
        gap = n % self._dp_world_size
        if gap > 0:
            self._dp_gap_size = self._dp_world_size - gap
            pad = jnp.zeros((self._dp_gap_size,) + x.shape[1:], dtype=x.dtype)
            x = jnp.concatenate([x, pad], axis=0)
            part_size = x.shape[0] // self._dp_world_size
        return x[local_part * part_size:(local_part + 1) * part_size]

    # dp_gather: concatenate per-rank results, drop padding.
    def dp_gather(self, parts):
        if self._dp_world_size == 1:
            return parts[0]
        gathered = jnp.concatenate(parts, axis=0)
        if self._dp_gap_size > 0:
            gathered = gathered[:-self._dp_gap_size]
            self.reset_dp_gap_size()
        return gathered

    def preprocess(self, x):
        return x

    def postprocess(self, y):
        return y

    def forward(self, x):
        return self.model(x)

    __call__ = forward


# ---------------------------------------------------------------------------
# Deterministic parameter init + smoke test
# ---------------------------------------------------------------------------
def init_params(key, d_in, hidden, d_out):
    k1, k2, k3, k4 = jax.random.split(key, 4)
    return {
        # Weights stored in bf16 (halves weight DMA; MXU is bf16 on v6e/v7x anyway).
        "w1": (jax.random.normal(k1, (d_in, hidden), jnp.float32) * 0.05).astype(jnp.bfloat16),
        "b1": jax.random.normal(k2, (1, hidden), jnp.float32) * 0.05,
        "w2": (jax.random.normal(k3, (hidden, d_out), jnp.float32) * 0.05).astype(jnp.bfloat16),
        "b2": jax.random.normal(k4, (1, d_out), jnp.float32) * 0.05,
    }


if __name__ == "__main__":
    key = jax.random.PRNGKey(0)
    kx, kp = jax.random.split(key)

    N, D_IN, HIDDEN, D_OUT, TP = 8, 32, 256, 32, 2
    x = jax.random.normal(kx, (N, D_IN), jnp.float32)
    params = init_params(kp, D_IN, HIDDEN, D_OUT)

    # Pure-JAX reference of the channel-parallel forward (bf16 weights).
    w1f = params["w1"].astype(jnp.float32)
    w2f = params["w2"].astype(jnp.float32)
    ref = jnp.maximum(x @ w1f + params["b1"], 0.0) @ w2f + params["b2"]

    # 1) Default tiling (single K step), f32 activations -> resident f32 output accumulator.
    module = ParallelModuleJAX(params, tp_size=TP, dp_world_size=1)
    x_local = module.dp_scatter(module.preprocess(x))
    y = module(x_local)
    y = module.postprocess(module.dp_gather([y]))
    y = jax.block_until_ready(y)
    assert y.shape == (N, D_OUT)
    assert y.dtype == x.dtype
    assert jnp.allclose(y, ref, atol=3e-2, rtol=3e-2), float(jnp.max(jnp.abs(y - ref)))

    # 2) Forced small K tile -> multiple reduction steps (exercises the accumulate branch).
    module_k = ParallelModuleJAX(params, tp_size=TP, dp_world_size=1, tile_k=128)
    y2 = jax.block_until_ready(module_k(x))
    assert jnp.allclose(y2, ref, atol=3e-2, rtol=3e-2), float(jnp.max(jnp.abs(y2 - ref)))

    # 3) bf16 activations -> f32 scratch accumulator + single cast on the last K step.
    xb = x.astype(jnp.bfloat16)
    y3 = jax.block_until_ready(module_k(xb))
    assert y3.dtype == jnp.bfloat16
    assert jnp.allclose(y3.astype(jnp.float32), ref, atol=6e-2, rtol=6e-2), \
        float(jnp.max(jnp.abs(y3.astype(jnp.float32) - ref)))

    # TODO(synk): multi-device CommContext all_gather / all_reduce (tensor- and data-
    # parallel comm) has no single-device Pallas equivalent; the TP all-reduce is realized
    # exactly as the trailing K-reduction grid axis, DP gather as a plain-JAX concatenate.
    print("KERNEL_OK")
</pallas_src>

<mosaic_0001>
module attributes {stable_mosaic.version = 11 : i64} {
  func.func @_mlp_kernel_f32out(%arg0: i32, %arg1: i32, %arg2: i32, %arg3: memref<8x128xbf16, #tpu.memory_space<vmem>>, %arg4: memref<128x256xbf16, #tpu.memory_space<vmem>>, %arg5: memref<1x256xf32, #tpu.memory_space<vmem>>, %arg6: memref<256x128xbf16, #tpu.memory_space<vmem>>, %arg7: memref<1x128xf32, #tpu.memory_space<vmem>>, %arg8: memref<8x128xf32, #tpu.memory_space<vmem>>) attributes {dimension_semantics = [#tpu.dimension_semantics<parallel>, #tpu.dimension_semantics<parallel>, #tpu.dimension_semantics<arbitrary>], iteration_bounds = array<i64: 1, 1, 1>, scalar_prefetch = 0 : i64, scratch_operands = 0 : i64, tpu.core_type = #tpu.core_type<tc>, window_params = [{transform_indices = @transform_0, window_bounds = array<i64: 8, 128>}, {transform_indices = @transform_1, window_bounds = array<i64: 128, 256>}, {transform_indices = @transform_2, window_bounds = array<i64: 1, 256>}, {transform_indices = @transform_3, window_bounds = array<i64: 256, 128>}, {transform_indices = @transform_4, window_bounds = array<i64: 1, 128>}, {transform_indices = @transform_5, window_bounds = array<i64: 8, 128>}]} {
    %c0 = arith.constant 0 : index
    %c0_0 = arith.constant 0 : index
    %0 = vector.load %arg3[%c0, %c0_0] : memref<8x128xbf16, #tpu.memory_space<vmem>>, vector<8x128xbf16>
    %c0_1 = arith.constant 0 : index
    %c0_2 = arith.constant 0 : index
    %1 = vector.load %arg4[%c0_1, %c0_2] : memref<128x256xbf16, #tpu.memory_space<vmem>>, vector<128x256xbf16>
    %cst = arith.constant dense<0.000000e+00> : vector<8x256xf32>
    %2 = tpu.matmul %0, %1, %cst {dimension_numbers = #tpu.dot_dimension_numbers<[1], [0], [0], [1], [0, 0, 1, 1], [], []>} : vector<8x128xbf16>, vector<128x256xbf16>, vector<8x256xf32> -> vector<8x256xf32>
    %c0_3 = arith.constant 0 : index
    %c0_4 = arith.constant 0 : index
    %3 = vector.load %arg5[%c0_3, %c0_4] : memref<1x256xf32, #tpu.memory_space<vmem>>, vector<1x256xf32>
    %4 = vector.broadcast %3 : vector<1x256xf32> to vector<8x256xf32>
    %5 = arith.addf %2, %4 : vector<8x256xf32>
    %cst_5 = arith.constant 0.000000e+00 : f32
    %6 = vector.broadcast %cst_5 : f32 to vector<8x256xf32>
    %7 = arith.maximumf %5, %6 : vector<8x256xf32>
    %8 = arith.truncf %7 : vector<8x256xf32> to vector<8x256xbf16>
    %c0_6 = arith.constant 0 : index
    %c0_7 = arith.constant 0 : index
    %9 = vector.load %arg6[%c0_6, %c0_7] : memref<256x128xbf16, #tpu.memory_space<vmem>>, vector<256x128xbf16>
    %cst_8 = arith.constant dense<0.000000e+00> : vector<8x128xf32>
    %10 = tpu.matmul %8, %9, %cst_8 {dimension_numbers = #tpu.dot_dimension_numbers<[1], [0], [0], [1], [0, 0, 1, 1], [], []>} : vector<8x256xbf16>, vector<256x128xbf16>, vector<8x128xf32> -> vector<8x128xf32>
    %c0_i32 = arith.constant 0 : i32
    %11 = arith.cmpi eq, %arg2, %c0_i32 : i32
    %12 = arith.extui %11 : i1 to i32
    %c0_i32_9 = arith.constant 0 : i32
    %13 = arith.cmpi ne, %12, %c0_i32_9 : i32
    scf.if %13 {
      %c0_12 = arith.constant 0 : index
      %c0_13 = arith.constant 0 : index
      %17 = vector.load %arg7[%c0_12, %c0_13] : memref<1x128xf32, #tpu.memory_space<vmem>>, vector<1x128xf32>
      %18 = vector.broadcast %17 : vector<1x128xf32> to vector<8x128xf32>
      %19 = arith.addf %10, %18 : vector<8x128xf32>
      %c0_14 = arith.constant 0 : index
      %c0_15 = arith.constant 0 : index
      %20 = vector.load %arg8[%c0_14, %c0_15] : memref<8x128xf32, #tpu.memory_space<vmem>>, vector<8x128xf32>
      tpu.vector_store %arg8[%c0_14, %c0_15], %19 {strides = array<i32>} : memref<8x128xf32, #tpu.memory_space<vmem>>, vector<8x128xf32>,
    } else {
    }
    %c0_i32_10 = arith.constant 0 : i32
    %14 = arith.cmpi ne, %arg2, %c0_i32_10 : i32
    %15 = arith.extui %14 : i1 to i32
    %c0_i32_11 = arith.constant 0 : i32
    %16 = arith.cmpi ne, %15, %c0_i32_11 : i32
    scf.if %16 {
      %c0_12 = arith.constant 0 : index
      %c0_13 = arith.constant 0 : index
      %17 = vector.load %arg8[%c0_12, %c0_13] : memref<8x128xf32, #tpu.memory_space<vmem>>, vector<8x128xf32>
      %18 = arith.addf %17, %10 : vector<8x128xf32>
      %c0_14 = arith.constant 0 : index
      %c0_15 = arith.constant 0 : index
      %19 = vector.load %arg8[%c0_14, %c0_15] : memref<8x128xf32, #tpu.memory_space<vmem>>, vector<8x128xf32>
      tpu.vector_store %arg8[%c0_14, %c0_15], %18 {strides = array<i32>} : memref<8x128xf32, #tpu.memory_space<vmem>>, vector<8x128xf32>,
    } else {
    }
    return
  }
  func.func @transform_0(%arg0: i32, %arg1: i32, %arg2: i32) -> (i32, i32) {
    %c0_i32 = arith.constant 0 : i32
    %c0_i32_0 = arith.constant 0 : i32
    return %arg0, %c0_i32 : i32, i32
  }
  func.func @transform_1(%arg0: i32, %arg1: i32, %arg2: i32) -> (i32, i32) {
    %c0_i32 = arith.constant 0 : i32
    %c0_i32_0 = arith.constant 0 : i32
    return %c0_i32, %arg2 : i32, i32
  }
  func.func @transform_2(%arg0: i32, %arg1: i32, %arg2: i32) -> (i32, i32) {
    %c0_i32 = arith.constant 0 : i32
    %c0_i32_0 = arith.constant 0 : i32
    return %c0_i32, %arg2 : i32, i32
  }
  func.func @transform_3(%arg0: i32, %arg1: i32, %arg2: i32) -> (i32, i32) {
    %c0_i32 = arith.constant 0 : i32
    return %arg2, %arg1 : i32, i32
  }
  func.func @transform_4(%arg0: i32, %arg1: i32, %arg2: i32) -> (i32, i32) {
    %c0_i32 = arith.constant 0 : i32
    %c0_i32_0 = arith.constant 0 : i32
    return %c0_i32, %arg1 : i32, i32
  }
  func.func @transform_5(%arg0: i32, %arg1: i32, %arg2: i32) -> (i32, i32) {
    %c0_i32 = arith.constant 0 : i32
    return %arg0, %arg1 : i32, i32
  }
}

</mosaic_0001>

<bundles_post_ra>
// kernel: tpu_custom_call.1
= control target key start
LH: loop header
LB: loop body
LE: loop exit
PB: predicated region body
PF: predicated region fallthrough
CT: control target
= control target key end

     0   :  { %10 = vsyncpa [#allocation3], 0  ;;  %s758_s0 = inlined_call_operand.hbm [shape: bf16[8,128], index: 0, kind: input, shape index: {}]   ;;  %s759_s1 = inlined_call_operand.hbm [shape: bf16[128,256], index: 1, kind: input, shape index: {}]   ;;  %s760_s2 = inlined_call_operand.hbm [shape: f32[1,256], index: 2, kind: input, shape index: {}]   ;;  %s761_s3 = inlined_call_operand.hbm [shape: bf16[256,128], index: 3, kind: input, shape index: {}]   ;;  %s762_s4 = inlined_call_operand.vmem [shape: f32[1,128], index: 4, kind: input, shape index: {}]   ;;  %s763_s5 = inlined_call_operand.hbm [shape: f32[8,128], index: 5, kind: output, shape index: {}]  }
   0x1   :  { %11 = vsyncpa [#allocation6], 0 }
   0x2   :  { %12 = vsyncpa [#allocation9], 0  ;;  %s29_s20 = sshll.u32 %s759_s1, 4  ;;  %s30_s20 = int_to_ptr.hbm [resolvable:$true] %s29_s20 }
   0x3   :  { %13 = vsyncpa [#allocation4], 0  ;;  %s701_s21 = smov [#allocation5]   ;;  %s19_s25 = sshll.u32 %s758_s0, 4  ;;  %s20_s25 = int_to_ptr.hbm [resolvable:$true] %s19_s25 }
   0x4   :  { %s31_s22 = sshll.u32 %s701_s21, 4  ;;  %s702_s26 = smov 128   ;;  %s32_s22 = int_to_ptr.vmem [resolvable:$true] %s31_s22 }
   0x5   :  { %s703_s27 = smov 8   ;;  %s704_s28 = smov [#allocation2]  }
   0x6   :  { %37 = dma.hbm_to_vmem [thread:$0]  %s30_s20, 2048, %s32_s22, [#allocation6], %s702_s26, %s702_s26, %s703_s27  }
   0x7   :  { %s21_s29 = sshll.u32 %s704_s28, 4  ;;  %s43_s7 = sshll.u32 %s760_s2, 4  ;;  %s22_s29 = int_to_ptr.vmem [resolvable:$true] %s21_s29  ;;  %s44_s7 = int_to_ptr.hbm [resolvable:$true] %s43_s7 }
   0x8   :  { %24 = dma.hbm_to_vmem [thread:$0]  %s20_s25, 64, %s22_s29, [#allocation3]  }
   0x9   :  { %s53_s9 = sshll.u32 %s761_s3, 4  ;;  %s705_s10 = smov [#allocation7]   ;;  %s54_s9 = int_to_ptr.hbm [resolvable:$true] %s53_s9 }
   0xa   :  { %s45_s11 = sshll.u32 %s705_s10, 4  ;;  %s706_s0 = smov [#allocation8]   ;;  %s46_s11 = int_to_ptr.vmem [resolvable:$true] %s45_s11 }
   0xb   :  { %48 = dma.hbm_to_vmem [thread:$0]  %s44_s7, 32, %s46_s11, [#allocation6]  }
   0xc   :  { %s55_s12 = sshll.u32 %s706_s0, 4  ;;  %s707_s13 = smov 64   ;;  %s56_s12 = int_to_ptr.vmem [resolvable:$true] %s55_s12 }
   0xd   :  { %s708_s14 = smov 4  }
   0xe   :  { %61 = dma.hbm_to_vmem [thread:$0]  %s54_s9, 2048, %s56_s12, [#allocation9], %s707_s13, %s707_s13, %s708_s14  }
   0xf   :  { %693 = dma.done.wait [#allocation3], 64  }
  0x10   :  { %694 = vsyncadd [#allocation3], 4294967232 }
  0x11   :  { %695 = dma.done.wait [#allocation6], 2080  }
  0x12   :  { %696 = vsyncadd [#allocation6], 4294965216 }
  0x13   :  { %697 = dma.done.wait [#allocation9], 2048  }
  0x14   :  { %698 = vsyncadd [#allocation9], 4294965248  ;;  %v461_v0 = vld [vmem:[#allocation5 + $0x70] sm:$0xf]  ;;  %v546_v1 = vld [vmem:[#allocation5 + $0x74] sm:$0xf0] }
  0x15   :  { %v545_v2 = vld [vmem:[#allocation5 + $0x74] sm:$0xf]  ;;  %v462_v3 = vor.u32 %v546_v1, %v461_v0  ;;  %v463_v4 = vld [vmem:[#allocation5 + $0x78] sm:$0xf0]  ;;  %v453_v5 = vld [vmem:[#allocation5 + $0x60] sm:$0xf] }
  0x16   :  { %v544_v6 = vld [vmem:[#allocation5 + $0x64] sm:$0xf0]  ;;  %v466_v7 = vor.u32 %v545_v2, %v463_v4  ;;  %v543_v8 = vld [vmem:[#allocation5 + $0x64] sm:$0xf]  ;;  %v455_v9 = vld [vmem:[#allocation5 + $0x68] sm:$0xf0] }
  0x17   :  { %183 = vmatpush.bf16.msra.mxu0 %v462_v3  ;;  %v454_v10 = vor.u32 %v544_v6, %v453_v5  ;;  %v458_v11 = vor.u32 %v543_v8, %v455_v9  ;;  %v445_v12 = vld [vmem:[#allocation5 + $0x50] sm:$0xf]  ;;  %v542_v13 = vld [vmem:[#allocation5 + $0x54] sm:$0xf0]  ;;  %v541_v14 = vld [vmem:[#allocation5 + $0x54] sm:$0xf] }
  0x18   :  { %196 = vmatpush.bf16.msra.mxu1 %v466_v7  ;;  %v447_v15 = vld [vmem:[#allocation5 + $0x58] sm:$0xf0]  ;;  %v446_v16 = vor.u32 %v542_v13, %v445_v12  ;;  %v437_v18 = vld [vmem:[#allocation5 + $0x40] sm:$0xf]  ;;  %v540_v19 = vld [vmem:[#allocation5 + $0x44] sm:$0xf0] }
  0x19   :  { %v450_v17 = vor.u32 %v541_v14, %v447_v15  ;;  %v539_v20 = vld [vmem:[#allocation5 + $0x44] sm:$0xf]  ;;  %v439_v21 = vld [vmem:[#allocation5 + $0x48] sm:$0xf0]  ;;  %v438_v22 = vor.u32 %v540_v19, %v437_v18  ;;  %v554_v23 = vld [vmem:[#allocation8 + $0x38] sm:$0xff]  ;;  %s709_s15 = smov [#allocation10]  }
  0x1a   :  { %v562_v24 = vld [vmem:[#allocation8 + $0x78] sm:$0xff]  ;;  %v442_v25 = vor.u32 %v539_v20, %v439_v21  ;;  %v429_v26 = vld [vmem:[#allocation5 + $0x30] sm:$0xf]  ;;  %v537_v28 = vld [vmem:[#allocation5 + $0x34] sm:$0xf]  ;;  %341 = vmatpush.bf16.msra.mxu2 %v554_v23  ;;  %s389_s16 = sshll.u32 %s709_s15, 4  ;;  %s390_s16 = int_to_ptr.vmem [resolvable:$true] %s389_s16 }
  0x1b   :  { %184 = vmatpush.bf16.msra.mxu0 %v454_v10  ;;  %v538_v27 = vld [vmem:[#allocation5 + $0x34] sm:$0xf0]  ;;  %v431_v29 = vld [vmem:[#allocation5 + $0x38] sm:$0xf0]  ;;  %354 = vmatpush.bf16.msra.mxu3 %v562_v24  ;;  %v421_v34 = vld [vmem:[#allocation5 + $0x20] sm:$0xf] }
  0x1c   :  { %197 = vmatpush.bf16.msra.mxu1 %v458_v11  ;;  %v553_v30 = vld [vmem:[#allocation8 + $0x30] sm:$0xff]  ;;  %v430_v32 = vor.u32 %v538_v27, %v429_v26  ;;  %v434_v33 = vor.u32 %v537_v28, %v431_v29  ;;  %v536_v35 = vld [vmem:[#allocation5 + $0x24] sm:$0xf0]  ;;  %v535_v36 = vld [vmem:[#allocation5 + $0x24] sm:$0xf]  ;;  %s391_s19 = sshll.u32 %s763_s5, 4  ;;  %s392_s19 = int_to_ptr.hbm [resolvable:$true] %s391_s19 }
  0x1d   :  { %v561_v31 = vld [vmem:[#allocation8 + $0x70] sm:$0xff]  ;;  %v423_v37 = vld [vmem:[#allocation5 + $0x28] sm:$0xf0]  ;;  %v422_v40 = vor.u32 %v536_v35, %v421_v34  ;;  %v415_v45 = vld [vmem:[#allocation5 + $0x18] sm:$0xf0] }
  0x1e   :  { %342 = vmatpush.bf16.msra.mxu2 %v553_v30  ;;  %v552_v38 = vld [vmem:[#allocation8 + $0x28] sm:$0xff]  ;;  %v426_v41 = vor.u32 %v535_v36, %v423_v37  ;;  %v534_v43 = vld [vmem:[#allocation5 + $0x14] sm:$0xf0]  ;;  %v533_v44 = vld [vmem:[#allocation5 + $0x14] sm:$0xf] }
  0x1f   :  { %185 = vmatpush.bf16.msra.mxu0 %v446_v16  ;;  %355 = vmatpush.bf16.msra.mxu3 %v561_v31  ;;  %v560_v39 = vld [vmem:[#allocation8 + $0x68] sm:$0xff]  ;;  %v551_v46 = vld [vmem:[#allocation8 + $0x20] sm:$0xff]  ;;  %v418_v49 = vor.u32 %v533_v44, %v415_v45  ;;  %v550_v54 = vld [vmem:[#allocation8 + $0x18] sm:$0xff] }
  0x20   :  { %198 = vmatpush.bf16.msra.mxu1 %v450_v17  ;;  %v413_v42 = vld [vmem:[#allocation5 + $0x10] sm:$0xf]  ;;  %v559_v47 = vld [vmem:[#allocation8 + $0x60] sm:$0xff]  ;;  %v407_v53 = vld [vmem:[#allocation5 + $0x8] sm:$0xf0] }
  0x21   :  { %v414_v48 = vor.u32 %v534_v43, %v413_v42  ;;  %v405_v50 = vld [vmem:[#allocation5] sm:$0xf]  ;;  %v532_v51 = vld [vmem:[#allocation5 + $0x4] sm:$0xf0]  ;;  %v531_v52 = vld [vmem:[#allocation5 + $0x4] sm:$0xf] }
  0x22   :  { %343 = vmatpush.bf16.msra.mxu2 %v552_v38  ;;  %v558_v55 = vld [vmem:[#allocation8 + $0x58] sm:$0xff]  ;;  %v406_v56 = vor.u32 %v532_v51, %v405_v50  ;;  %v410_v57 = vor.u32 %v531_v52, %v407_v53  ;;  %v549_v58 = vld [vmem:[#allocation8 + $0x10] sm:$0xff]  ;;  %v548_v61 = vld [vmem:[#allocation8 + $0x8] sm:$0xff] }
  0x23   :  { %186 = vmatpush.bf16.msra.mxu0 %v438_v22  ;;  %356 = vmatpush.bf16.msra.mxu3 %v560_v39  ;;  %v557_v59 = vld [vmem:[#allocation8 + $0x50] sm:$0xff]  ;;  %v80_v60 = vld [vmem:[#allocation2] sm:$0xf]  ;;  %v556_v62 = vld [vmem:[#allocation8 + $0x48] sm:$0xff] }
  0x24   :  { %199 = vmatpush.bf16.msra.mxu1 %v442_v25  ;;  %v547_v63 = vld [vmem:[#allocation8] sm:$0xff]  ;;  %v97_v1 = vld [vmem:[#allocation7] sm:$0x3]  ;;  %v572_v15 = vld [vmem:[%s762_s4] ss:$0 sm:$0xff] }
  0x25   :  { %v555_v0 = vld [vmem:[#allocation8 + $0x40] sm:$0xff]  ;;  %v99_v2 = vperm.slane %v97_v1, 0  ;;  %v100_v3 = vperm.slane %v97_v1, 1 }
  0x26   :  { %344 = vmatpush.bf16.msra.mxu2 %v551_v46 }
  0x27   :  { %187 = vmatpush.bf16.msra.mxu0 %v430_v32  ;;  %357 = vmatpush.bf16.msra.mxu3 %v559_v47 }
  0x28   :  { %200 = vmatpush.bf16.msra.mxu1 %v434_v33 }
  0x2a   :  { %345 = vmatpush.bf16.msra.mxu2 %v550_v54 }
  0x2b   :  { %188 = vmatpush.bf16.msra.mxu0 %v422_v40  ;;  %358 = vmatpush.bf16.msra.mxu3 %v558_v55 }
  0x2c   :  { %201 = vmatpush.bf16.msra.mxu1 %v426_v41 }
  0x2e   :  { %346 = vmatpush.bf16.msra.mxu2 %v549_v58 }
  0x2f   :  { %189 = vmatpush.bf16.msra.mxu0 %v414_v48  ;;  %359 = vmatpush.bf16.msra.mxu3 %v557_v59 }
  0x30   :  { %202 = vmatpush.bf16.msra.mxu1 %v418_v49 }
  0x32   :  { %347 = vmatpush.bf16.msra.mxu2 %v548_v61 }
  0x33   :  { %190 = vmatpush.bf16.msra.mxu0 %v406_v56  ;;  %360 = vmatpush.bf16.msra.mxu3 %v556_v62 }
  0x34   :  { %203 = vmatpush.bf16.msra.mxu1 %v410_v57 }
  0x36   :  { %191 = vmatmul.bf16.vlgmr.msra.gmra.mxu0 %v80_v60  ;;  %348 = vmatpush.bf16.msra.mxu2 %v547_v63 }
  0x37   :  { %204 = vmatmul.bf16.vlgmr.msra.gmra.mxu1 %v80_v60  ;;  %361 = vmatpush.bf16.msra.mxu3 %v555_v0 }
  0xb3   :  { %v192_v4 = vpop.f32.mrf.mxu0 }
  0xb4   :  { %v193_v5 = vadd.f32 %v192_v4, %v99_v2  ;;  %v205_v6 = vpop.f32.mrf.mxu1 }
  0xb5   :  { %v206_v7 = vadd.f32 %v205_v6, %v100_v3 }
  0xb6   :  { %v209_v8 = vmax.f32 %v193_v5, 0.0 }
  0xb7   :  { %v210_v9 = vmax.f32 %v206_v7, 0.0 }
  0xb8   :  { %v211_v10 = vpack.c.bf16 %v209_v8, %v209_v8 }
  0xb9   :  { %v212_v11 = vpack.c.bf16 %v210_v9, %v210_v9 }
  0xba   :  { %349 = vmatmul.bf16.vlgmr.msra.gmra.mxu2 %v211_v10 }
  0xbb   :  { %362 = vmatmul.bf16.vlgmr.msra.gmra.mxu3 %v212_v11  ;;  %v194_v12 = vpop.f32.mrf.mxu0 }
  0xbc   :  { %v207_v13 = vpop.f32.mrf.mxu1 }
 0x13d   :  { %v350_v14 = vpop.f32.mrf.mxu2 }
 0x13e   :  { %v363_v16 = vpop.f32.mrf.mxu3 }
 0x13f   :  { %v364_v17 = vadd.f32 %v363_v16, %v350_v14 }
 0x141   :  { %v375_v18 = vadd.f32 %v572_v15, %v364_v17 }
 0x143   :  { %376 = vst [vmem:[#allocation10] sm:$0xff] %v375_v18 }
 0x144   :  { %394 = dma.vmem_to_hbm [thread:$0]  %s390_s16, 128, %s392_s19, [#allocation4]  }
 0x145   :  { %v352_v19 = vpop.f32.mrf.mxu2 }
 0x146   :  { %v365_v20 = vpop.f32.mrf.mxu3 }
 0x147   :  { %699 = dma.done.wait [#allocation4], 128  }
 0x148   :  { %700 = vsyncadd [#allocation4], 4294967168 }
 0x149   :  { %399 = vsyncpa [#allocation3], 1 }
 0x14a   :  { %400 = vsyncpa [#allocation6], 1 }
 0x14b   :  { %401 = vsyncpa [#allocation9], 1 }
 0x14c   :  { %402 = vsyncpa [#allocation4], 1 }

</bundles_post_ra>
